<compile_context>
chip_gen: v7x
topology: tpu7x:2x2x1
jax: 0.10.0
libtpu: 0.0.40
codegen_flags: <defaults>
</compile_context>

<pallas_src>
import functools
import math

import jax
import jax.numpy as jnp
from jax.experimental import pallas as pl
from jax.experimental.pallas import tpu as pltpu

_HIGHEST = jax.lax.Precision.HIGHEST


# ---------------------------------------------------------------------------
# Small host-side helpers.
# ---------------------------------------------------------------------------
def _round_up(n: int, m: int) -> int:
    return ((n + m - 1) // m) * m


def _largest_divisor_leq(n: int, cap: int) -> int:
    """Largest divisor of n that is <= cap (>= 1)."""
    cap = max(1, min(n, cap))
    for d in range(cap, 0, -1):
        if n % d == 0:
            return d
    return 1


def _pad_rows(x, n_to: int):
    b, n, h = x.shape
    if n_to == n:
        return x
    return jnp.pad(x, ((0, 0), (0, n_to - n), (0, 0)))


def _hw_budgets():
    """(vmem_limit_bytes, target_table_block_bytes) per TPU generation."""
    cap = 64 << 20
    try:
        cap = int(getattr(pltpu.get_tpu_info(), "vmem_capacity_bytes", cap))
    except Exception:  # no TPU info available -> be conservative (v7x-sized)
        pass
    if cap >= (100 << 20):            # v5e / v6e: 128 MiB physical VMEM
        return 64 << 20, 16 << 20
    return 44 << 20, 16 << 20         # v7x: 64 MiB physical VMEM -> leave headroom


# ---------------------------------------------------------------------------
# RoPE tables + rotation folded into the weight matrix.
# ---------------------------------------------------------------------------
def rope_tables(seq_len: int, hidden_dim: int):
    pos = jnp.arange(seq_len, dtype=jnp.float32)[:, None]              # (N, 1)
    idx = jnp.arange(hidden_dim // 2, dtype=jnp.float32)               # (H/2,)
    theta = jnp.power(10000.0, -2.0 * idx / hidden_dim)                # (H/2,)
    ang = pos * theta                                                   # (N, H/2)
    cos_pos = jnp.repeat(jnp.cos(ang), 2, axis=-1)                      # [c0,c0,c1,c1,...]
    sin_pos = jnp.repeat(jnp.sin(ang), 2, axis=-1)                      # [s0,s0,s1,s1,...]
    return cos_pos.astype(jnp.float32), sin_pos.astype(jnp.float32)     # (N, H) each


def _rot_weight(w):
    """W_rot such that rope(x) @ W == (x*cos) @ W + (x*sin) @ W_rot.

    W_rot[2i] = W[2i+1], W_rot[2i+1] = -W[2i]  (row pair-swap with sign flip).
    """
    h = w.shape[0]
    wp = w.reshape(h // 2, 2, -1)
    return jnp.stack([wp[:, 1, :], -wp[:, 0, :]], axis=1).reshape(w.shape)


# ---------------------------------------------------------------------------
# Pre-pass: (x*cos) @ W + (x*sin) @ W_rot + bias, batched over all rows.
# ---------------------------------------------------------------------------
def _rope_linear_kernel(x_ref, cos_ref, sin_ref, w_ref, wrot_ref, b_ref, out_ref):
    x = x_ref[0].astype(jnp.float32)                                    # (TR, H)
    xc = x * cos_ref[...]
    xs = x * sin_ref[...]
    out = (jnp.dot(xc, w_ref[...], preferred_element_type=jnp.float32,
                   precision=_HIGHEST)
           + jnp.dot(xs, wrot_ref[...], preferred_element_type=jnp.float32,
                     precision=_HIGHEST)
           + b_ref[...])
    out_ref[0] = out.astype(out_ref.dtype)


def _rope_linear(x, cos_pos, sin_pos, w, w_rot, bias_row, *, vmem_limit):
    """rope(x) @ w + bias over all (B, N) rows (rotation folded into w_rot).  f32 out."""
    b_sz, n, h = x.shape
    ow = w.shape[1]
    tr = 8 * _largest_divisor_leq(n // 8, 32)          # up to 256 rows per block
    grid = (b_sz, n // tr)
    return pl.pallas_call(
        _rope_linear_kernel,
        out_shape=jax.ShapeDtypeStruct((b_sz, n, ow), jnp.float32),
        grid_spec=pltpu.PrefetchScalarGridSpec(
            num_scalar_prefetch=0,
            grid=grid,
            in_specs=[
                pl.BlockSpec((1, tr, h), lambda b, i: (b, i, 0)),
                pl.BlockSpec((tr, h), lambda b, i: (i, 0)),
                pl.BlockSpec((tr, h), lambda b, i: (i, 0)),
                pl.BlockSpec((h, ow), lambda b, i: (0, 0)),
                pl.BlockSpec((h, ow), lambda b, i: (0, 0)),
                pl.BlockSpec((1, ow), lambda b, i: (0, 0)),
            ],
            out_specs=pl.BlockSpec((1, tr, ow), lambda b, i: (b, i, 0)),
        ),
        compiler_params=pltpu.CompilerParams(
            dimension_semantics=("parallel", "parallel"),
            vmem_limit_bytes=vmem_limit,
        ),
    )(x, cos_pos, sin_pos, w, w_rot, bias_row)


# ---------------------------------------------------------------------------
# Table kernel: out = relu(a (+) c), HBM-writeback bound, lane-dense stores.
# ---------------------------------------------------------------------------
def _table_kernel_flat(a_ref, c_ref, out_ref, *, cw, rc):
    """a_ref:   (1, TNR, CW)    review rows, lane-replicated to CW = lcm(H, 128) (via MXU)
    c_ref:   (1, 1, CWBLK)   flattened reply columns (bias already folded in)
    out_ref: (1, TNR, CWBLK) lane-dense output slab (CW, CWBLK multiples of 128)

    Columns outer (static), row chunks inner (static); the reply-column broadcast is
    hoisted above the row loop so it is emitted once per column.  Every slice is static
    and 8/128-aligned -> dense unmasked vector stores + dense writeback DMA.
    """
    tnr = a_ref.shape[1]
    cwblk = out_ref.shape[2]
    for c0 in range(0, cwblk, cw):                          # static columns
        c_b = jnp.broadcast_to(c_ref[0, :, c0:c0 + cw], (rc, cw))   # hoisted broadcast
        for r0 in range(0, tnr, rc):                        # static row chunks
            a_blk = a_ref[0, r0:r0 + rc, :]                 # (RC, CW) f32
            out_ref[0, r0:r0 + rc, c0:c0 + cw] = jnp.maximum(
                a_blk + c_b, 0.0).astype(out_ref.dtype)


def _plan_table_tiles(n_rev_pad, w_flat, cw, out_itemsize, target_block_bytes,
                      *, max_bodies=128, chunk_f32_bytes=64 * 1024):
    """Pick (tnr, rc, cwblk): tnr | n_rev_pad (multiple of rc, rc multiple of 8),
    cwblk | w_flat (multiple of cw).  Output block ~target bytes, bounded by the static
    unroll budget (max_bodies chunk bodies) and a per-chunk f32 footprint of ~16 vregs
    (chunk + hoisted column broadcast + result stay inside the 64-vreg file, no spills)."""
    n_cols = w_flat // cw
    # Columns per block: as wide as possible (fewer `a` re-reads, longer contiguous
    # stores), keeping room for >= 8 rows in the target block.
    col_cap = max(1, target_block_bytes // (8 * cw * out_itemsize))
    ncb = _largest_divisor_leq(n_cols, min(col_cap, 16))
    cwblk = ncb * cw
    # Rows per compute chunk: ~chunk_f32_bytes of f32 per (rc, cw) value.
    rc_units = max(1, chunk_f32_bytes // (cw * 4 * 8))
    rc = 8 * _largest_divisor_leq(n_rev_pad // 8, rc_units)
    # Row chunks per block: fill the target block, bounded by the code-size budget.
    max_chunks_bytes = max(1, target_block_bytes // (cwblk * rc * out_itemsize))
    max_chunks_code = max(1, max_bodies // ncb)
    tnr = rc * _largest_divisor_leq(n_rev_pad // rc,
                                    min(max_chunks_bytes, max_chunks_code))
    return tnr, rc, cwblk


# ---------------------------------------------------------------------------
# Public entry point.
# ---------------------------------------------------------------------------
def position_wised_table_encoder(review, reply, weight, bias, *, out_dtype=None):
    """review: (B, Nr, H), reply: (B, Np, H), weight: (2H, H) (pre-transposed), bias: (H,).

    Returns relu(Linear(cat(rope(review)_i, rope(reply)_j))) of shape (B, Nr, Np, H).
    out_dtype=jnp.bfloat16 is strongly recommended for performance (halves the dominant
    HBM writeback; the add/relu math stays f32).  Default keeps the input dtype so the
    module's forward semantics are preserved bit-for-bit in behavior.
    """
    b_sz, n_rev, h = review.shape
    _, n_rep, _ = reply.shape
    if out_dtype is None:
        out_dtype = review.dtype
    out_itemsize = jnp.dtype(out_dtype).itemsize

    vmem_limit, target_block_bytes = _hw_budgets()

    # Lane replication: each review-row vector is replicated rep times so a row occupies
    # CW = lcm(H, 128) lanes and every table column chunk is a full 128-lane multiple.
    rep = 128 // math.gcd(h, 128)                      # power of two
    cw = rep * h                                       # lcm(H, 128)

    # Pad rows: review rows to a multiple of 8 (sublane tiling), reply rows so that
    # (Np_pad * H) is a multiple of CW (and hence 128) -> the lane-dense flat path is
    # always taken; padded rows/columns are sliced off at the end.
    n_rev_pad = _round_up(n_rev, 8)
    n_rep_pad = _round_up(n_rep, max(8, rep))
    w_flat = n_rep_pad * h

    review_p = _pad_rows(review, n_rev_pad)
    reply_p = _pad_rows(reply, n_rep_pad)

    cos_r, sin_r = rope_tables(n_rev_pad, h)
    cos_p, sin_p = rope_tables(n_rep_pad, h)

    w1 = weight[:h, :].astype(jnp.float32)             # review half (H, H)
    w2 = weight[h:, :].astype(jnp.float32)             # reply  half (H, H)
    w1r = _rot_weight(w1)
    w2r = _rot_weight(w2)
    # Tiling the review-side weight along lanes makes the MXU emit `a` already replicated
    # to CW lanes, so the table kernel never does an in-kernel lane shuffle.
    if rep > 1:
        w1 = jnp.tile(w1, (1, rep))                    # (H, CW)
        w1r = jnp.tile(w1r, (1, rep))
    bias2d = bias.reshape(1, h).astype(jnp.float32)

    # Pre-pass (RoPE folded into weights, bias folded into the reply side).
    # TODO(synk): for very small tables the pre-pass could be fused into the table kernel
    # (VMEM scratch + pl.when on the first column tile) to skip its HBM round-trip.
    a = _rope_linear(review_p, cos_r, sin_r, w1, w1r,
                     jnp.zeros((1, cw), jnp.float32), vmem_limit=vmem_limit)   # (B,Nr',CW)
    c = _rope_linear(reply_p, cos_p, sin_p, w2, w2r, bias2d,
                     vmem_limit=vmem_limit)                                     # (B,Np',H)
    c_flat = c.reshape(b_sz, 1, w_flat)                # lane-dense reply columns (free)

    tnr, rc, cwblk = _plan_table_tiles(n_rev_pad, w_flat, cw, out_itemsize,
                                       target_block_bytes)
    # v7x megacore balance: if the total (all-parallel) grid is small and odd, split the
    # row tile once more so both TensorCores get (nearly) equal work.
    total_steps = b_sz * (n_rev_pad // tnr) * (w_flat // cwblk)
    if total_steps % 2 == 1 and total_steps < 64 and tnr % (2 * rc) == 0:
        tnr //= 2

    grid = (b_sz, n_rev_pad // tnr, w_flat // cwblk)
    out_flat = pl.pallas_call(
        functools.partial(_table_kernel_flat, cw=cw, rc=rc),
        out_shape=jax.ShapeDtypeStruct((b_sz, n_rev_pad, w_flat), out_dtype),
        grid_spec=pltpu.PrefetchScalarGridSpec(
            num_scalar_prefetch=0,
            grid=grid,
            in_specs=[
                pl.BlockSpec((1, tnr, cw), lambda b, i, j: (b, i, 0)),
                pl.BlockSpec((1, 1, cwblk), lambda b, i, j: (b, 0, j)),
            ],
            out_specs=pl.BlockSpec((1, tnr, cwblk), lambda b, i, j: (b, i, j)),
        ),
        compiler_params=pltpu.CompilerParams(
            dimension_semantics=("parallel", "parallel", "parallel"),
            vmem_limit_bytes=vmem_limit,
        ),
    )(a, c_flat)

    out = out_flat.reshape(b_sz, n_rev_pad, n_rep_pad, h)
    if n_rev_pad != n_rev or n_rep_pad != n_rep:
        out = out[:, :n_rev, :n_rep, :]
    return out


# ---------------------------------------------------------------------------
# Pure-JAX reference mirroring the PyTorch forward exactly (HIGHEST-precision f32 matmul).
# ---------------------------------------------------------------------------
def _rope_ref(x):
    _, n, h = x.shape
    cos_pos, sin_pos = rope_tables(n, h)
    x_even = x[..., ::2]
    x_odd = x[..., 1::2]
    x1 = jnp.stack([-x_odd, x_even], axis=-1).reshape(x.shape)
    return x * cos_pos[None] + x1 * sin_pos[None]


def reference(review, reply, weight, bias):
    b, n_rev, h = review.shape
    _, n_rep, _ = reply.shape
    rv = _rope_ref(review)
    rp = _rope_ref(reply)
    exp_rev = jnp.broadcast_to(rv[:, :, None, :], (b, n_rev, n_rep, h))
    exp_rep = jnp.broadcast_to(rp[:, None, :, :], (b, n_rev, n_rep, h))
    cross = jnp.concatenate([exp_rev, exp_rep], axis=-1)              # (B, Nr, Np, 2H)
    out = jnp.matmul(cross, weight, precision=_HIGHEST) + bias        # Linear(2H -> H)
    return jnp.maximum(out, 0.0)


# ---------------------------------------------------------------------------
if __name__ == "__main__":
    B, NR, NP, H = 2, 8, 16, 32

    key = jax.random.PRNGKey(0)
    k_rev, k_rep, k_w, k_b = jax.random.split(key, 4)

    review = jax.random.normal(k_rev, (B, NR, H), dtype=jnp.float32)
    reply = jax.random.normal(k_rep, (B, NP, H), dtype=jnp.float32)

    # nn.Linear(2H, H): weight (H, 2H), bias (H); stored transposed -> (2H, H).
    bound = 1.0 / math.sqrt(2 * H)
    weight = jax.random.uniform(k_w, (2 * H, H), minval=-bound, maxval=bound,
                                dtype=jnp.float32)
    bias = jax.random.uniform(k_b, (H,), minval=-bound, maxval=bound,
                              dtype=jnp.float32)

    # 1) f32 output (module semantics); decomposition is mathematically exact -> tight tol.
    out = jax.block_until_ready(
        position_wised_table_encoder(review, reply, weight, bias))
    ref = reference(review, reply, weight, bias)
    assert out.shape == (B, NR, NP, H)
    assert jnp.allclose(out, ref, rtol=1e-4, atol=1e-4), "f32 path mismatch vs reference"

    # 2) bf16 writeback (recommended perf mode): halves the dominant HBM store.
    out_bf16 = jax.block_until_ready(
        position_wised_table_encoder(review, reply, weight, bias,
                                     out_dtype=jnp.bfloat16))
    assert out_bf16.dtype == jnp.bfloat16
    assert jnp.allclose(out_bf16.astype(jnp.float32), ref, rtol=2e-2, atol=2e-2), \
        "bf16 path mismatch vs reference"

    # 3) Ragged shapes (row padding + lane padding replace the old masked-store fallback).
    review_r = review[:, :7, :]
    reply_r = reply[:, :6, :]
    out_r = jax.block_until_ready(
        position_wised_table_encoder(review_r, reply_r, weight, bias))
    ref_r = reference(review_r, reply_r, weight, bias)
    assert out_r.shape == (B, 7, 6, H)
    assert jnp.allclose(out_r, ref_r, rtol=1e-4, atol=1e-4), \
        "padded path mismatch vs reference"

    print("KERNEL_OK")
</pallas_src>

<mosaic_0001>
module attributes {stable_mosaic.version = 11 : i64} {
  func.func @_rope_linear_kernel(%arg0: i32, %arg1: i32, %arg2: memref<1x8x32xf32, #tpu.memory_space<vmem>>, %arg3: memref<8x32xf32, #tpu.memory_space<vmem>>, %arg4: memref<8x32xf32, #tpu.memory_space<vmem>>, %arg5: memref<32x128xf32, #tpu.memory_space<vmem>>, %arg6: memref<32x128xf32, #tpu.memory_space<vmem>>, %arg7: memref<1x128xf32, #tpu.memory_space<vmem>>, %arg8: memref<1x8x128xf32, #tpu.memory_space<vmem>>) attributes {dimension_semantics = [#tpu.dimension_semantics<parallel>, #tpu.dimension_semantics<parallel>], iteration_bounds = array<i64: 2, 1>, scalar_prefetch = 0 : i64, scratch_operands = 0 : i64, tpu.core_type = #tpu.core_type<tc>, window_params = [{transform_indices = @transform_0, window_bounds = array<i64: 1, 8, 32>}, {transform_indices = @transform_1, window_bounds = array<i64: 8, 32>}, {transform_indices = @transform_2, window_bounds = array<i64: 8, 32>}, {pipeline_mode = #tpu.pipeline_mode<synchronous>, transform_indices = @transform_3, window_bounds = array<i64: 32, 128>}, {pipeline_mode = #tpu.pipeline_mode<synchronous>, transform_indices = @transform_4, window_bounds = array<i64: 32, 128>}, {pipeline_mode = #tpu.pipeline_mode<synchronous>, transform_indices = @transform_5, window_bounds = array<i64: 1, 128>}, {transform_indices = @transform_6, window_bounds = array<i64: 1, 8, 128>}]} {
    %c0 = arith.constant 0 : index
    %c0_0 = arith.constant 0 : index
    %c0_1 = arith.constant 0 : index
    %0 = vector.load %arg2[%c0, %c0_0, %c0_1] : memref<1x8x32xf32, #tpu.memory_space<vmem>>, vector<1x8x32xf32>
    %1 = vector.shape_cast %0 : vector<1x8x32xf32> to vector<8x32xf32>
    %c0_2 = arith.constant 0 : index
    %c0_3 = arith.constant 0 : index
    %2 = vector.load %arg3[%c0_2, %c0_3] : memref<8x32xf32, #tpu.memory_space<vmem>>, vector<8x32xf32>
    %3 = arith.mulf %1, %2 : vector<8x32xf32>
    %c0_4 = arith.constant 0 : index
    %c0_5 = arith.constant 0 : index
    %4 = vector.load %arg4[%c0_4, %c0_5] : memref<8x32xf32, #tpu.memory_space<vmem>>, vector<8x32xf32>
    %5 = arith.mulf %1, %4 : vector<8x32xf32>
    %c0_6 = arith.constant 0 : index
    %c0_7 = arith.constant 0 : index
    %6 = vector.load %arg5[%c0_6, %c0_7] : memref<32x128xf32, #tpu.memory_space<vmem>>, vector<32x128xf32>
    %cst = arith.constant dense<0.000000e+00> : vector<8x128xf32>
    %7 = tpu.matmul %3, %6, %cst {dimension_numbers = #tpu.dot_dimension_numbers<[1], [0], [0], [1], [0, 0, 1, 1], [], []>, precision = #tpu.contract_precision<fp32>} : vector<8x32xf32>, vector<32x128xf32>, vector<8x128xf32> -> vector<8x128xf32>
    %c0_8 = arith.constant 0 : index
    %c0_9 = arith.constant 0 : index
    %8 = vector.load %arg6[%c0_8, %c0_9] : memref<32x128xf32, #tpu.memory_space<vmem>>, vector<32x128xf32>
    %cst_10 = arith.constant dense<0.000000e+00> : vector<8x128xf32>
    %9 = tpu.matmul %5, %8, %cst_10 {dimension_numbers = #tpu.dot_dimension_numbers<[1], [0], [0], [1], [0, 0, 1, 1], [], []>, precision = #tpu.contract_precision<fp32>} : vector<8x32xf32>, vector<32x128xf32>, vector<8x128xf32> -> vector<8x128xf32>
    %10 = arith.addf %7, %9 : vector<8x128xf32>
    %c0_11 = arith.constant 0 : index
    %c0_12 = arith.constant 0 : index
    %11 = vector.load %arg7[%c0_11, %c0_12] : memref<1x128xf32, #tpu.memory_space<vmem>>, vector<1x128xf32>
    %12 = vector.broadcast %11 : vector<1x128xf32> to vector<8x128xf32>
    %13 = arith.addf %10, %12 : vector<8x128xf32>
    %c0_13 = arith.constant 0 : index
    %c0_14 = arith.constant 0 : index
    %c0_15 = arith.constant 0 : index
    %14 = vector.load %arg8[%c0_13, %c0_14, %c0_15] : memref<1x8x128xf32, #tpu.memory_space<vmem>>, vector<1x8x128xf32>
    %15 = vector.shape_cast %14 : vector<1x8x128xf32> to vector<8x128xf32>
    %16 = vector.shape_cast %13 : vector<8x128xf32> to vector<1x8x128xf32>
    tpu.vector_store %arg8[%c0_13, %c0_14, %c0_15], %16 {strides = array<i32>} : memref<1x8x128xf32, #tpu.memory_space<vmem>>, vector<1x8x128xf32>,
    return
  }
  func.func @transform_0(%arg0: i32, %arg1: i32) -> (i32, i32, i32) {
    %c0_i32 = arith.constant 0 : i32
    %c0_i32_0 = arith.constant 0 : i32
    return %arg0, %arg1, %c0_i32 : i32, i32, i32
  }
  func.func @transform_1(%arg0: i32, %arg1: i32) -> (i32, i32) {
    %c0_i32 = arith.constant 0 : i32
    %c0_i32_0 = arith.constant 0 : i32
    return %arg1, %c0_i32 : i32, i32
  }
  func.func @transform_2(%arg0: i32, %arg1: i32) -> (i32, i32) {
    %c0_i32 = arith.constant 0 : i32
    %c0_i32_0 = arith.constant 0 : i32
    return %arg1, %c0_i32 : i32, i32
  }
  func.func @transform_3(%arg0: i32, %arg1: i32) -> (i32, i32) {
    %c0_i32 = arith.constant 0 : i32
    %c0_i32_0 = arith.constant 0 : i32
    %c0_i32_1 = arith.constant 0 : i32
    return %c0_i32, %c0_i32_0 : i32, i32
  }
  func.func @transform_4(%arg0: i32, %arg1: i32) -> (i32, i32) {
    %c0_i32 = arith.constant 0 : i32
    %c0_i32_0 = arith.constant 0 : i32
    %c0_i32_1 = arith.constant 0 : i32
    return %c0_i32, %c0_i32_0 : i32, i32
  }
  func.func @transform_5(%arg0: i32, %arg1: i32) -> (i32, i32) {
    %c0_i32 = arith.constant 0 : i32
    %c0_i32_0 = arith.constant 0 : i32
    %c0_i32_1 = arith.constant 0 : i32
    return %c0_i32, %c0_i32_0 : i32, i32
  }
  func.func @transform_6(%arg0: i32, %arg1: i32) -> (i32, i32, i32) {
    %c0_i32 = arith.constant 0 : i32
    %c0_i32_0 = arith.constant 0 : i32
    return %arg0, %arg1, %c0_i32 : i32, i32, i32
  }
}

</mosaic_0001>

<bundles_post_ra>
// kernel: tpu_custom_call.1
= control target key start
LH: loop header
LB: loop body
LE: loop exit
PB: predicated region body
PF: predicated region fallthrough
CT: control target
= control target key end

     0   :  { %s2575_s0 = inlined_call_operand.hbm [shape: f32[2,8,32], index: 0, kind: input, shape index: {}]   ;;  %s2576_s1 = inlined_call_operand.hbm [shape: f32[8,32], index: 1, kind: input, shape index: {}]   ;;  %s2577_s2 = inlined_call_operand.hbm [shape: f32[8,32], index: 2, kind: input, shape index: {}]   ;;  %s2578_s3 = inlined_call_operand.hbm [shape: f32[32,128], index: 3, kind: input, shape index: {}]   ;;  %s2579_s4 = inlined_call_operand.hbm [shape: f32[32,128], index: 4, kind: input, shape index: {}]   ;;  %s2580_s5 = inlined_call_operand.vmem [shape: f32[1,128], index: 5, kind: input, shape index: {}]   ;;  %s2581_s6 = inlined_call_operand.hbm [shape: f32[2,8,128], index: 6, kind: output, shape index: {}]  }
   0x1   :  { %2587 = sst [smem:[#allocation16_spill]] %s2576_s1 }
   0x2   :  { %11 = vsyncpa [#allocation3], 0 }
   0x3   :  { %13 = vsyncpa [#allocation3 + $0x1], 0 }
   0x4   :  { %14 = vsyncpa [#allocation6], 0 }
   0x5   :  { %15 = vsyncpa [#allocation9], 0 }
   0x6   :  { %16 = vsyncpa [#allocation4], 0 }
   0x7   :  { %18 = vsyncpa [#allocation4 + $0x1], 0  ;;  %s2162_s21 = smov 0   ;;  %s2164_s22 = smov 0  }
   0x8   :  { %s2166_s23 = smov 0   ;;  %s2168_s24 = smov 0  }
   0x9   :  { %s2170_s25 = smov 0   ;;  %s2172_s26 = smov 0  }
   0xa LB: > { %s2585_s27 = sadd.s32 4294967295, %s2114_s26   ;;  %p1490_p0 = scmp.ge.s32.totalorder %s2114_s26, 1  ;;  %s2114_s26 = sphi %s2172_s26, %s24_s26   ;;  %s2110_s25 = sphi %s2170_s25, %s2609_s25   ;;  %s2106_s24 = sphi %s2168_s24, %s2608_s24   ;;  %s2102_s23 = sphi %s2166_s23, %s2607_s23   ;;  %s2098_s22 = sphi %s2164_s22, %s2606_s22   ;;  %s2094_s21 = sphi %s2162_s21, %s2605_s21  }
   0xb   : > { %p2196_p1 = scmp.eq.s32.totalorder %s2585_s27, 0  ;;  %p212_p2 = scmp.lt.s32.totalorder %s2114_s26, 3 }
   0xc   : > { %s2116_s30 = smov [#allocation5]   ;;  %s2117_s8 = smov [#allocation8]  }
   0xd   : > { %s2588_s28 = scalar_select %p2196_p1, 1, 0 }
   0xe   : > { %p2201_p3 = pnand %p1490_p0, %p212_p2  ;;  %s227_s7 = sshll.u32 %s2116_s30, 4  ;;  %s228_s7 = int_to_ptr.vmem [resolvable:$true] %s227_s7 }
   0xf   : > { %s250_s9 = sshll.u32 %s2117_s8, 4  ;;  %s2118_s11 = smov [#allocation7]   ;;  %s2214_s9 = int_to_ptr.vmem [resolvable:$true] %s250_s9 }
  0x10   : > { %s2589_s29 = scalar_select %p2201_p3, 1, 0 }
  0x11   : > { %p1794_p5 = pneg %p2201_p3  ;;  %s2216_s12 = sshll.u32 %s2118_s11, 4  ;;  %s241_s12 = int_to_ptr.vmem [resolvable:$true] %s2216_s12 }
  0x12   : > { %s2591_s1 = sld [smem:[#allocation16_spill]] }
  0x13   : > { %p2210_p6 = pnand %p1794_p5, %p2196_p1 }
  0x15   : > { %p2226_p8 = pneg %p2210_p6 }
  0x18   : > { %s1882_s15 = scalar_lea.hbm %s2591_s1, 128 }
  0x19   : > { %p1883_p7 = scmp.ne.s32.totalorder %s2591_s1, %s1882_s15  ;;  %p1889_p11 = scmp.lt.u32.totalorder %s1882_s15, %s2591_s1 }
  0x1b   : > { %p1885_p9 = pnand %p2226_p8, %p1883_p7 }
  0x1d   : > { %p1886_p10 = pneg %p1885_p9 }
  0x1f   : > { %p1891_p12 = pnand %p1889_p11, %p1886_p10 }
  0x21   : > { %1894 = shalt.err (!%p1891_p12)
}
  0x22   : > { %s1895_s30 = scalar_lea.vmem %s228_s7, 128  ;;  %p1903_p5 = scmp.lt.s32.totalorder %s228_s7, %s228_s7 }
  0x23   : > { %p1896_p13 = scmp.ne.s32.totalorder %s228_s7, %s1895_s30  ;;  %p1904_p4 = scmp.lt.s32.totalorder %s1895_s30, %s1895_s30 }
  0x25   : > { %p1898_p0 = pnand %p1896_p13, %p2226_p8  ;;  %p1905_p3 = por %p1904_p4, %p1903_p5 }
  0x27   : > { %p1899_p2 = pneg %p1898_p0 }
  0x29   : > { %p1906_p1 = pnand %p1905_p3, %p1899_p2 }
  0x2b   : > { %1909 = shalt.err (!%p1906_p1)
}
  0x2c   : > { %1797 = dma.hbm_to_vmem [thread:$0]  (!%p2210_p6), %s2591_s1, 128, %s228_s7, [#allocation6]  }
  0x2d   : > { %s1910_s15 = scalar_lea.hbm %s2578_s3, 512 }
  0x2e   : > { %p1911_p7 = scmp.ne.s32.totalorder %s2578_s3, %s1910_s15  ;;  %p1917_p1 = scmp.lt.u32.totalorder %s1910_s15, %s2578_s3 }
  0x30   : > { %p1913_p9 = pnand %p1911_p7, %p2226_p8 }
  0x32   : > { %p1914_p4 = pneg %p1913_p9 }
  0x34   : > { %p1919_p3 = pnand %p1917_p1, %p1914_p4 }
  0x36   : > { %1922 = shalt.err (!%p1919_p3)
}
  0x37   : > { %s1923_s7 = scalar_lea.vmem %s2214_s9, 512  ;;  %p1931_p13 = scmp.lt.s32.totalorder %s2214_s9, %s2214_s9 }
  0x38   : > { %p1924_p10 = scmp.ne.s32.totalorder %s2214_s9, %s1923_s7  ;;  %p1932_p0 = scmp.lt.s32.totalorder %s1923_s7, %s1923_s7 }
  0x3a   : > { %p1926_p11 = pnand %p1924_p10, %p2226_p8  ;;  %p1933_p2 = por %p1932_p0, %p1931_p13 }
  0x3c   : > { %p1927_p12 = pneg %p1926_p11 }
  0x3e   : > { %p1934_p5 = pnand %p1933_p2, %p1927_p12 }
  0x40   : > { %1937 = shalt.err (!%p1934_p5)
}
  0x41   : > { %s2119_s30 = smov 128   ;;  %s2120_s8 = smov 8  }
  0x42   : > { %1803 = dma.hbm_to_vmem [thread:$0]  (!%p2210_p6), %s2578_s3, 512, %s2214_s9, [#allocation9], %s2119_s30, %s2119_s30, %s2120_s8  }
  0x43   : > { %s1938_s16 = scalar_lea.hbm %s2577_s2, 128 }
  0x44   : > { %p1939_p7 = scmp.ne.s32.totalorder %s2577_s2, %s1938_s16  ;;  %p1945_p1 = scmp.lt.u32.totalorder %s1938_s16, %s2577_s2 }
  0x46   : > { %p1941_p9 = pnand %p1939_p7, %p2226_p8 }
  0x48   : > { %p1942_p4 = pneg %p1941_p9 }
  0x4a   : > { %p1947_p3 = pnand %p1945_p1, %p1942_p4 }
  0x4c   : > { %1950 = shalt.err (!%p1947_p3)
}
  0x4d   : > { %s1951_s11 = scalar_lea.vmem %s241_s12, 128  ;;  %p1959_p13 = scmp.lt.s32.totalorder %s241_s12, %s241_s12 }
  0x4e   : > { %p1952_p10 = scmp.ne.s32.totalorder %s241_s12, %s1951_s11  ;;  %p1960_p0 = scmp.lt.s32.totalorder %s1951_s11, %s1951_s11 }
  0x50   : > { %p1954_p11 = pnand %p1952_p10, %p2226_p8  ;;  %p1961_p2 = por %p1960_p0, %p1959_p13 }
  0x52   : > { %p1955_p12 = pneg %p1954_p11 }
  0x54   : > { %p1962_p5 = pnand %p1961_p2, %p1955_p12 }
  0x56   : > { %1965 = shalt.err (!%p1962_p5)
}
  0x57   : > { %1800 = dma.hbm_to_vmem [thread:$0]  (!%p2210_p6), %s2577_s2, 128, %s241_s12, [#allocation6]  }
  0x58   : > { %s2121_s14 = smov [#allocation10]   ;;  %s1966_s19 = scalar_lea.hbm %s2579_s4, 512 }
  0x59   : > { %s263_s15 = sshll.u32 %s2121_s14, 4  ;;  %p1967_p7 = scmp.ne.s32.totalorder %s2579_s4, %s1966_s19  ;;  %s264_s15 = int_to_ptr.vmem [resolvable:$true] %s263_s15 }
  0x5a   : > { %p1973_p1 = scmp.lt.u32.totalorder %s1966_s19, %s2579_s4 }
  0x5b   : > { %p1969_p9 = pnand %p1967_p7, %p2226_p8 }
  0x5d   : > { %p1970_p4 = pneg %p1969_p9 }
  0x5f   : > { %p1975_p3 = pnand %p1973_p1, %p1970_p4 }
  0x61   : > { %1978 = shalt.err (!%p1975_p3)
}
  0x62   : > { %s1979_s12 = scalar_lea.vmem %s264_s15, 512  ;;  %p1987_p13 = scmp.lt.s32.totalorder %s264_s15, %s264_s15 }
  0x63   : > { %p1980_p10 = scmp.ne.s32.totalorder %s264_s15, %s1979_s12  ;;  %p1988_p0 = scmp.lt.s32.totalorder %s1979_s12, %s1979_s12 }
  0x65   : > { %p1982_p11 = pnand %p1980_p10, %p2226_p8  ;;  %p1989_p2 = por %p1988_p0, %p1987_p13 }
  0x67   : > { %p1983_p12 = pneg %p1982_p11 }
  0x69   : > { %p1990_p5 = pnand %p1989_p2, %p1983_p12 }
  0x6b   : > { %1993 = shalt.err (!%p1990_p5)
}
  0x6c   : > { %1806 = dma.hbm_to_vmem [thread:$0]  (!%p2210_p6), %s2579_s4, 512, %s264_s15, [#allocation9], %s2119_s30, %s2119_s30, %s2120_s8  }
  0x6d   : > { %s1489_s10 = sadd.s32 4294967294, %s2114_s26   ;;  %s36_s18 = sadd.s32 1, %s2110_s25 }
  0x6e   : > { %p38_p8 = scmp.ge.s32.totalorder %s36_s18, 2  ;;  %s45_s13 = sadd.s32 1, %s2102_s23 }
  0x6f   : > { %p52_p7 = scmp.ne.s32.totalorder %s2102_s23, %s2098_s22  ;;  %p53_p9 = scmp.eq.s32.totalorder %s2114_s26, 0 }
  0x70   : > { %s2611_s18 = smov (%p38_p8, %s36_s18), 0  ;;  %p58_p1 = scmp.ne.s32.totalorder %s2098_s22, %s2094_s21 }
  0x71   : > { %p2316_p4 = por %p53_p9, %p52_p7  ;;  %s40_s30 = ssub.s32 %s2110_s25, %s2611_s18 }
  0x72   : > { %s2594_s8 = sadd.s32 4294967295, %s2114_s26   ;;  %p43_p3 = scmp.eq.s32.totalorder %s40_s30, 0 }
  0x73   : > { %p199_p6 = scmp.eq.s32.totalorder %s2594_s8, 1  ;;  %p2595_p10 = scmp.ne.s32.totalorder %s2588_s28, 0 }
  0x74   : > { %p205_p13 = scmp.eq.s32.totalorder %s1489_s10, 1  ;;  %p1819_p2 = scmp.lt.s32.totalorder %s2114_s26, 2 }
  0x75   : > { %p2328_p11 = por %p2595_p10, %p58_p1  ;;  %p2332_p12 = por %p199_p6, %p52_p7 }
  0x76   : > { %s2337_s17 = scalar_select %p43_p3, %s2102_s23, %s45_s13  }
  0x77   : > { %s2597_s16 = scalar_select %p2332_p12, 1, 0 }
  0x78   : > { %p2339_p0 = por %p205_p13, %p58_p1  ;;  %s280_s20 = sand.u32 1, %s2102_s23  }
  0x79   : > { %s1497_s7 = sshll.u32 %s2110_s25, 7  ;;  %s1496_s11 = sshll.u32 %s280_s20, 3 }
  0x7a   : > { %s2598_s19 = scalar_select %p2339_p0, 1, 0 }
  0x7b   : > { %s2349_s9 = scalar_lea.hbm %s2575_s0, %s1497_s7  ;;  %s284_s10 = scalar_lea.vmem [#allocation2], %s1496_s11 }
  0x7c   : > { %s292_s13 = sshll.u32 %s284_s10, 4  ;;  %p2353_p5 = pnand %p1819_p2, %p2316_p4  ;;  %s2357_s13 = int_to_ptr.vmem [resolvable:$true] %s292_s13 }
  0x7d   : > { %s281_s8 = scalar_lea.sflag [#allocation3], %s280_s20  ;;  %s1994_s1 = scalar_lea.hbm %s2349_s9, 128 }
  0x7e   : > { %p1995_p8 = scmp.ne.s32.totalorder %s2349_s9, %s1994_s1  ;;  %p1996_p7 = pneg %p2353_p5 }
  0x7f   : > { %s1999_s14 = scalar_lea.hbm %s2575_s0, 256  ;;  %p2000_p4 = scmp.lt.u32.totalorder %s2349_s9, %s2575_s0 }
  0x80   : > { %p1997_p9 = pnand %p1996_p7, %p1995_p8  ;;  %p2001_p6 = scmp.lt.u32.totalorder %s1999_s14, %s1994_s1 }
  0x81   : > { %p2003_p10 = scmp.lt.u32.totalorder %s1994_s1, %s2349_s9 }
  0x82   : > { %p1998_p1 = pneg %p1997_p9  ;;  %p2002_p3 = por %p2001_p6, %p2000_p4 }
  0x84   : > { %p2004_p13 = por %p2003_p10, %p2002_p3 }
  0x86   : > { %p2005_p2 = pnand %p2004_p13, %p1998_p1 }
  0x88   : > { %2008 = shalt.err (!%p2005_p2)
}
  0x89   : > { %s2009_s20 = scalar_lea.vmem %s2357_s13, 128  ;;  %s2122_s10 = smov [#allocation2]  }
  0x8a   : > { %p2010_p8 = scmp.ne.s32.totalorder %s2357_s13, %s2009_s20  ;;  %s2014_s7 = sshll.u32 %s2122_s10, 4  ;;  %s2015_s7 = int_to_ptr.vmem [resolvable:$false] %s2014_s7 }
  0x8b   : > { %s2016_s11 = scalar_lea.vmem %s2015_s7, 256  ;;  %p2017_p12 = scmp.lt.s32.totalorder %s2357_s13, %s2015_s7 }
  0x8c   : > { %p2012_p9 = pnand %p2010_p8, %p1996_p7  ;;  %p2018_p4 = scmp.lt.s32.totalorder %s2016_s11, %s2009_s20 }
  0x8e   : > { %p2013_p0 = pneg %p2012_p9  ;;  %p2019_p6 = por %p2018_p4, %p2017_p12 }
  0x90   : > { %p2020_p3 = pnand %p2019_p6, %p2013_p0 }
  0x92   : > { %2023 = shalt.err (!%p2020_p3)
}
  0x93   : > { %1810 = dma.hbm_to_vmem [thread:$0]  (!%p2353_p5), %s2349_s9, 128, %s2357_s13, %s281_s8  }
  0x94   : > { %p2600_p1 = scmp.ne.s32.totalorder %s2589_s29, 0 }
  0x95   : > { %s2387_s1 = sand.u32 (!%p2600_p1), 1, %s2098_s22  }
  0x96   : > { %301 = sbr.rel (%p2600_p1) target bundleno = 454 (0x1c6), region = 44  ;;  %s1499_s14 = sshll.u32 (!%p2600_p1), %s2387_s1, 3 }
  0x97   : > { %s304_s12 = scalar_lea.sflag (!%p2600_p1), [#allocation3], %s2387_s1  ;;  %s307_s27 = scalar_lea.vmem (!%p2600_p1), [#allocation2], %s1499_s14 }
  0x9d   : > { %2077 = dma.done.wait (%p2328_p11), %s304_s12, 128  }
  0x9e   : > { %2079 = vsyncadd (%p2328_p11), %s304_s12, 4294967168  ;;  %p2601_p12 = scmp.ne.s32.totalorder %s2588_s28, 0 }
  0xa0   : > { %2081 = dma.done.wait (%p2601_p12), [#allocation6], 256  }
  0xa1   : > { %2083 = vsyncadd (%p2601_p12), [#allocation6], 4294967040 }
  0xa2   : > { %2085 = dma.done.wait (%p2601_p12), [#allocation9], 1024  }
  0xa3   : > { %2087 = vsyncadd (%p2601_p12), [#allocation9], 4294966272  ;;  %v2123_v0 = vmov 0.0|0.0   ;;  %vm2124_vm0 = vmmov 0   ;;  %v2125_v1 = vmov 0.0   ;;  %v361_v2 = vld [vmem:[#allocation10] sm:$0xff] }
  0xa4   : > { %1702 = vmatprep.subr.bf16.mxu0 %v2123_v0  ;;  %1708 = vmatprep.subr.bf16.mxu1 %v2123_v0  ;;  %v362_v3 = vld [vmem:[#allocation10 + $0x8] sm:$0xff]  ;;  %v363_v4 = vld [vmem:[#allocation10 + $0x10] sm:$0xff]  ;;  %v370_v5 = vand.u32 4294901760, %v361_v2  ;;  %v364_v7 = vld [vmem:[#allocation10 + $0x18] sm:$0xff]  ;;  %vm365_vm1 = vcmask 261120   ;;  %s1507_s15 = sshll.u32 %s2106_s24, 7 }
  0xa5   : > { %1578 = vmatprep.mubr.msk.f32.mxu0 %vm2124_vm0, %v2125_v1  ;;  %1589 = vmatprep.mubr.msk.f32.mxu1 %vm2124_vm0, %v2125_v1  ;;  %v373_v6 = vand.u32 4294901760, %v362_v3  ;;  %v376_v8 = vand.u32 4294901760, %v363_v4  ;;  %v352_v9 = vld [vmem:[%s307_s27] sm:$0xff]  ;;  %v379_v10 = vand.u32 4294901760, %v364_v7  ;;  %v355_v11 = vld [vmem:[#allocation7] sm:$0xff]  ;;  %v353_v31 = vld [vmem:[#allocation5] sm:$0xff]  ;;  %s2526_s20 = scalar_lea.hbm %s2581_s6, %s1507_s15 }
  0xa6   : > { %v2413_v13 = vsub.f32 %v361_v2, %v370_v5  ;;  %v356_v17 = vmul.f32 %v355_v11, %v352_v9  ;;  %v357_v35 = vld [vmem:[#allocation8] sm:$0xff]  ;;  %v358_v36 = vld [vmem:[#allocation8 + $0x8] sm:$0xff]  ;;  %v354_v39 = vmul.f32 %v353_v31, %v352_v9  ;;  %v359_v45 = vld [vmem:[#allocation8 + $0x10] sm:$0xff]  ;;  %s351_s9 = scalar_lea.vmem [#allocation11], %s1499_s14  ;;  %s1352_s10 = scalar_lea.sflag [#allocation4], %s2387_s1 }
  0xa7   : > { %v2411_v12 = vpack.c.bf16 %v373_v6, %v370_v5  ;;  %v457_v14 = vsub.f32 %v362_v3, %v373_v6  ;;  %v2415_v15 = vsub.f32 %v363_v4, %v376_v8  ;;  %v2417_v16 = vsub.f32 %v364_v7, %v379_v10  ;;  %v360_v46 = vld [vmem:[#allocation8 + $0x18] sm:$0xff]  ;;  %s1366_s13 = sshll.u32 %s351_s9, 4  ;;  %p2602_p0 = scmp.ne.s32.totalorder %s2597_s16, 0  ;;  %s2528_s13 = int_to_ptr.vmem [resolvable:$true] %s1366_s13 }
  0xa8   : > { %v2420_v18 = vpack.c.bf16 %v379_v10, %v376_v8  ;;  %v451_v19 = vand.u32 4294901760, %v2413_v13  ;;  %v367_v21 = vsel %vm365_vm1, %v356_v17, 0  ;;  %v858_v42 = vand.u32 4294901760, %v357_v35  ;;  %s2024_s7 = scalar_lea.vmem %s2528_s13, 128  ;;  %s2126_s24 = smov [#allocation11]  }
  0xa9   : > { %1704 = vmatpush3.bf16.msra.mxu0 %v2411_v12  ;;  %v458_v20 = vand.u32 4294901760, %v457_v14  ;;  %v465_v22 = vand.u32 4294901760, %v2415_v15  ;;  %v472_v23 = vand.u32 4294901760, %v2417_v16  ;;  %v2428_v26 = vand.u32 4294901760, %v367_v21  ;;  %p2025_p11 = scmp.ne.s32.totalorder %s2528_s13, %s2024_s7  ;;  %s2028_s11 = sshll.u32 %s2126_s24, 4  ;;  %s2029_s11 = int_to_ptr.vmem [resolvable:$false] %s2028_s11 }
  0xaa   : > { %1705 = vmatprep.subr.bf16.mxu0 %v2123_v0  ;;  %v452_v24 = vsub.f32 %v2413_v13, %v451_v19  ;;  %v861_v43 = vand.u32 4294901760, %v358_v36  ;;  %v1715_v44 = vpack.c.bf16 %v457_v14, %v2413_v13  ;;  %v855_v48 = vsel %vm365_vm1, %v354_v39, 0  ;;  %s2030_s14 = scalar_lea.vmem %s2029_s11, 256  ;;  %p2031_p10 = scmp.lt.s32.totalorder %s2528_s13, %s2029_s11 }
  0xab   : > { %v459_v25 = vsub.f32 %v457_v14, %v458_v20  ;;  %v466_v27 = vsub.f32 %v2415_v15, %v465_v22  ;;  %v473_v28 = vsub.f32 %v2417_v16, %v472_v23  ;;  %v439_v32 = vsub.f32 %v367_v21, %v2428_v26  ;;  %p2026_p5 = pnand %p2025_p11, %p2602_p0  ;;  %p2032_p13 = scmp.lt.s32.totalorder %s2030_s14, %s2024_s7 }
  0xac   : > { %v453_v29 = vand.u32 4294901760, %v452_v24  ;;  %v2438_v49 = vsub.f32 %v357_v35, %v858_v42  ;;  %v2440_v50 = vsub.f32 %v358_v36, %v861_v43  ;;  %v864_v51 = vand.u32 4294901760, %v359_v45 }
  0xad   : > { %1707 = vmatpush3.bf16.msra.mxu0 %v2420_v18  ;;  %v460_v30 = vand.u32 4294901760, %v459_v25  ;;  %v467_v33 = vand.u32 4294901760, %v466_v27  ;;  %v474_v34 = vand.u32 4294901760, %v473_v28  ;;  %v440_v38 = vand.u32 4294901760, %v439_v32  ;;  %p2027_p7 = pneg %p2026_p5  ;;  %p2033_p2 = por %p2032_p13, %p2031_p10 }
  0xae   : > { %1714 = vmatprep.subr.bf16.mxu0 %v2123_v0  ;;  %v867_v52 = vand.u32 4294901760, %v360_v46  ;;  %v1718_v53 = vpack.c.bf16 %v2417_v16, %v2415_v15  ;;  %v2448_v54 = vand.u32 4294901760, %v855_v48  ;;  %v2454_v55 = vsub.f32 %v359_v45, %v864_v51 }
  0xaf   : > { %v1709_v37 = vpack.c.bf16 %v460_v30, %v453_v29  ;;  %v441_v40 = vsub.f32 %v439_v32, %v440_v38  ;;  %v1712_v41 = vpack.c.bf16 %v474_v34, %v467_v33  ;;  %v939_v57 = vand.u32 4294901760, %v2438_v49  ;;  %p2034_p8 = pnand %p2033_p2, %p2027_p7 }
  0xb0   : > { %v2456_v56 = vsub.f32 %v360_v46, %v867_v52  ;;  %v946_v58 = vand.u32 4294901760, %v2440_v50  ;;  %v1727_v59 = vpack.c.bf16 %v458_v20, %v451_v19  ;;  %v2463_v60 = vsub.f32 %v855_v48, %v2448_v54 }
  0xb1   : > { %1710 = vmatpush3.bf16.msra.mxu1 %v1709_v37  ;;  %v442_v47 = vand.u32 4294901760, %v441_v40  ;;  %v940_v61 = vsub.f32 %v2438_v49, %v939_v57  ;;  %v953_v63 = vand.u32 4294901760, %v2454_v55  ;;  %v1730_v3 = vpack.c.bf16 %v472_v23, %v465_v22 }
  0xb2   : > { %1711 = vmatprep.subr.bf16.mxu1 %v2123_v0  ;;  %v947_v62 = vsub.f32 %v2440_v50, %v946_v58  ;;  %v960_v2 = vand.u32 4294901760, %v2456_v56  ;;  %v928_v4 = vand.u32 4294901760, %v2463_v60  ;;  %v1739_v9 = vpack.c.bf16 %v861_v43, %v858_v42 }
  0xb3   : > { %1579 = vmatmul.mubr.f32.vlgmr.msra.gmra.mrb[0].mxu0 %v442_v47  ;;  %v941_v5 = vand.u32 4294901760, %v940_v61  ;;  %v954_v7 = vsub.f32 %v2454_v55, %v953_v63  ;;  %v1742_v14 = vpack.c.bf16 %v867_v52, %v864_v51  ;;  %v1751_v17 = vpack.c.bf16 %v2440_v50, %v2438_v49  ;;  %v1505_v52 = vld [vmem:[%s2580_s5] ss:$0 sm:$0xff] }
  0xb4   : > { %1716 = vmatpush3.bf16.msra.mxu0 %v1715_v44  ;;  %1600 = vmatprep.mubr.msk.f32.mxu0 %vm2124_vm0, %v2125_v1  ;;  %v948_v6 = vand.u32 4294901760, %v947_v62  ;;  %v961_v8 = vsub.f32 %v2456_v56, %v960_v2  ;;  %v929_v11 = vsub.f32 %v2463_v60, %v928_v4  ;;  %v1763_v19 = vpack.c.bf16 %v946_v58, %v939_v57 }
  0xb5   : > { %1713 = vmatpush3.bf16.msra.mxu1 %v1712_v41  ;;  %1717 = vmatprep.subr.bf16.mxu0 %v2123_v0  ;;  %v1766_v20 = vpack.c.bf16 %v960_v2, %v953_v63 }
  0xb6   : > { %1720 = vmatprep.subr.bf16.mxu1 %v2123_v0  ;;  %v1745_v10 = vpack.c.bf16 %v948_v6, %v941_v5  ;;  %v962_v13 = vand.u32 4294901760, %v961_v8  ;;  %v930_v15 = vand.u32 4294901760, %v929_v11 }
  0xb8   : > { %1590 = vmatmul.mubr.f32.vlgmr.msra.gmra.mrb[0].mxu1 %v2428_v26  ;;  %1719 = vmatpush3.bf16.msra.mxu0 %v1718_v53 }
  0xb9   : > { %1722 = vmatpush3.bf16.msra.mxu1 %v2411_v12  ;;  %1611 = vmatprep.mubr.msk.f32.mxu1 %vm2124_vm0, %v2125_v1 }
  0xba   : > { %1723 = vmatprep.subr.bf16.mxu1 %v2123_v0  ;;  %1726 = vmatprep.subr.bf16.mxu0 %v2123_v0 }
  0xbb   : > { %1601 = vmatmul.mubr.f32.vlgmr.msra.gmra.mrb[2].mxu0 %v439_v32 }
  0xbc   : > { %1728 = vmatpush3.bf16.msra.mxu0 %v1727_v59  ;;  %1622 = vmatprep.mubr.msk.f32.mxu0 %vm2124_vm0, %v2125_v1 }
  0xbd   : > { %1725 = vmatpush3.bf16.msra.mxu1 %v2420_v18  ;;  %1729 = vmatprep.subr.bf16.mxu0 %v2123_v0 }
  0xbe   : > { %1732 = vmatprep.subr.bf16.mxu1 %v2123_v0 }
  0xc0   : > { %1612 = vmatmul.mubr.f32.vlgmr.msra.gmra.mrb[2].mxu1 %v440_v38  ;;  %1731 = vmatpush3.bf16.msra.mxu0 %v1730_v3 }
  0xc1   : > { %1734 = vmatpush3.bf16.msra.mxu1 %v2411_v12  ;;  %1633 = vmatprep.mubr.msk.f32.mxu1 %vm2124_vm0, %v2125_v1  ;;  %v955_v12 = vand.u32 4294901760, %v954_v7 }
  0xc2   : > { %1735 = vmatprep.subr.bf16.mxu1 %v2123_v0  ;;  %1738 = vmatprep.subr.bf16.mxu0 %v2123_v0 }
  0xc3   : > { %1623 = vmatmul.mubr.f32.vlgmr.msra.gmra.mrb[4].mxu0 %v2428_v26  ;;  %v1748_v16 = vpack.c.bf16 %v962_v13, %v955_v12 }
  0xc4   : > { %1740 = vmatpush3.bf16.msra.mxu0 %v1739_v9  ;;  %1644 = vmatprep.mubr.msk.f32.mxu0 %vm2124_vm0, %v2125_v1 }
  0xc5   : > { %1737 = vmatpush3.bf16.msra.mxu1 %v2420_v18  ;;  %1741 = vmatprep.subr.bf16.mxu0 %v2123_v0  ;;  %v1754_v18 = vpack.c.bf16 %v2456_v56, %v2454_v55 }
  0xc6   : > { %1744 = vmatprep.subr.bf16.mxu1 %v2123_v0 }
  0xc8   : > { %1634 = vmatmul.mubr.f32.vlgmr.msra.gmra.mrb[4].mxu1 %v2428_v26  ;;  %1743 = vmatpush3.bf16.msra.mxu0 %v1742_v14 }
  0xc9   : > { %1746 = vmatpush3.bf16.msra.mxu1 %v1745_v10  ;;  %1655 = vmatprep.mubr.msk.f32.mxu1 %vm2124_vm0, %v2125_v1 }
  0xca   : > { %1747 = vmatprep.subr.bf16.mxu1 %v2123_v0  ;;  %1750 = vmatprep.subr.bf16.mxu0 %v2123_v0 }
  0xcb   : > { %1645 = vmatmul.mubr.f32.vlgmr.msra.gmra.mrb[6].mxu0 %v930_v15 }
  0xcc   : > { %1752 = vmatpush3.bf16.msra.mxu0 %v1751_v17  ;;  %1666 = vmatprep.mubr.msk.f32.mxu0 %vm2124_vm0, %v2125_v1 }
  0xcd   : > { %1749 = vmatpush3.bf16.msra.mxu1 %v1748_v16  ;;  %1753 = vmatprep.subr.bf16.mxu0 %v2123_v0 }
  0xce   : > { %1756 = vmatprep.subr.bf16.mxu1 %v2123_v0 }
  0xd0   : > { %1656 = vmatmul.mubr.f32.vlgmr.msra.gmra.mrb[6].mxu1 %v2448_v54  ;;  %1755 = vmatpush3.bf16.msra.mxu0 %v1754_v18 }
  0xd1   : > { %1758 = vmatpush3.bf16.msra.mxu1 %v1739_v9  ;;  %1677 = vmatprep.mubr.msk.f32.mxu1 %vm2124_vm0, %v2125_v1 }
  0xd2   : > { %1759 = vmatprep.subr.bf16.mxu1 %v2123_v0  ;;  %1762 = vmatprep.subr.bf16.mxu0 %v2123_v0 }
  0xd3   : > { %1667 = vmatmul.mubr.f32.vlgmr.msra.gmra.mrb[8].mxu0 %v2463_v60 }
  0xd4   : > { %1764 = vmatpush3.bf16.msra.mxu0 %v1763_v19  ;;  %1688 = vmatprep.mubr.msk.f32.mxu0 %vm2124_vm0, %v2125_v1 }
  0xd5   : > { %1761 = vmatpush3.bf16.msra.mxu1 %v1742_v14  ;;  %1765 = vmatprep.subr.bf16.mxu0 %v2123_v0 }
  0xd6   : > { %1768 = vmatprep.subr.bf16.mxu1 %v2123_v0 }
  0xd8   : > { %1678 = vmatmul.mubr.f32.vlgmr.msra.gmra.mrb[8].mxu1 %v928_v4  ;;  %1767 = vmatpush3.bf16.msra.mxu0 %v1766_v20 }
  0xd9   : > { %1770 = vmatpush3.bf16.msra.mxu1 %v1739_v9  ;;  %1699 = vmatprep.mubr.msk.f32.mxu1 %vm2124_vm0, %v2125_v1 }
  0xda   : > { %1771 = vmatprep.subr.bf16.mxu1 %v2123_v0 }
  0xdb   : > { %1689 = vmatmul.mubr.f32.vlgmr.msra.gmra.mrb[10].mxu0 %v2448_v54 }
  0xdd   : > { %1773 = vmatpush3.bf16.msra.mxu1 %v1742_v14 }
  0xe0   : > { %1700 = vmatmul.mubr.f32.vlgmr.msra.gmra.mrb[10].mxu1 %v2448_v54 }
 0x186   : > { %v444_v21 = vpop.f32.mrb[0].mxu0 }
 0x187   : > { %v1580_v22 = vpop.f32.mrb[1].mxu0 }
 0x18b   : > { %v535_v23 = vpop.f32.mrb[0].mxu1 }
 0x18c   : > { %v536_v24 = vadd.f32 %v535_v23, %v444_v21  ;;  %v1591_v25 = vpop.f32.mrb[1].mxu1 }
 0x18e   : > { %v615_v26 = vpop.f32.mrb[2].mxu0 }
 0x18f   : > { %v616_v27 = vadd.f32 %v615_v26, %v536_v24  ;;  %v1602_v28 = vpop.f32.mrb[3].mxu0 }
 0x193   : > { %v692_v29 = vpop.f32.mrb[2].mxu1 }
 0x194   : > { %v693_v30 = vadd.f32 %v692_v29, %v616_v27  ;;  %v1613_v31 = vpop.f32.mrb[3].mxu1 }
 0x196   : > { %v775_v1 = vpop.f32.mrb[4].mxu0 }
 0x197   : > { %v776_v32 = vadd.f32 %v775_v1, %v693_v30  ;;  %v1624_v33 = vpop.f32.mrb[5].mxu0 }
 0x19b   : > { %v850_v0 = vpop.f32.mrb[4].mxu1 }
 0x19c   : > { %v851_v34 = vadd.f32 %v850_v0, %v776_v32  ;;  %v1635_v35 = vpop.f32.mrb[5].mxu1 }
 0x19e   : > { %v932_v36 = vpop.f32.mrb[6].mxu0 }
 0x19f   : > { %v933_v37 = vadd.f32 %v932_v36, %v851_v34  ;;  %v1646_v38 = vpop.f32.mrb[7].mxu0 }
 0x1a3   : > { %v1023_v39 = vpop.f32.mrb[6].mxu1 }
 0x1a4   : > { %v1024_v40 = vadd.f32 %v1023_v39, %v933_v37  ;;  %v1657_v41 = vpop.f32.mrb[7].mxu1 }
 0x1a6   : > { %v1103_v42 = vpop.f32.mrb[8].mxu0 }
 0x1a7   : > { %v1104_v43 = vadd.f32 %v1103_v42, %v1024_v40  ;;  %v1668_v44 = vpop.f32.mrb[9].mxu0 }
 0x1ab   : > { %v1180_v45 = vpop.f32.mrb[8].mxu1 }
 0x1ac   : > { %v1181_v46 = vadd.f32 %v1180_v45, %v1104_v43  ;;  %v1679_v47 = vpop.f32.mrb[9].mxu1 }
 0x1ae   : > { %v1263_v48 = vpop.f32.mrb[10].mxu0 }
 0x1af   : > { %v1264_v49 = vadd.f32 %v1263_v48, %v1181_v46  ;;  %v1690_v50 = vpop.f32.mrb[11].mxu0 }
 0x1b3   : > { %v1338_v51 = vpop.f32.mrb[10].mxu1 }
 0x1b4   : > { %v1339_v53 = vadd.f32 %v1338_v51, %v1264_v49  ;;  %v1701_v54 = vpop.f32.mrb[11].mxu1 }
 0x1b6   : > { %v1349_v55 = vadd.f32 %v1505_v52, %v1339_v53 }
 0x1b8   : > { %1350 = vst [vmem:[%s351_s9] sm:$0xff] %v1349_v55 }
 0x1b9   : > { %2037 = shalt.err (!%p2034_p8)
}
 0x1ba   : > { %s2038_s1 = scalar_lea.hbm %s2526_s20, 128  ;;  %s2042_s28 = scalar_lea.hbm %s2581_s6, 256 }
 0x1bb   : > { %p2039_p9 = scmp.ne.s32.totalorder %s2526_s20, %s2038_s1  ;;  %p2043_p3 = scmp.lt.u32.totalorder %s2526_s20, %s2581_s6 }
 0x1bc   : > { %p2044_p1 = scmp.lt.u32.totalorder %s2042_s28, %s2038_s1  ;;  %p2046_p11 = scmp.lt.u32.totalorder %s2038_s1, %s2526_s20 }
 0x1bd   : > { %p2040_p4 = pnand %p2039_p9, %p2602_p0 }
 0x1be   : > { %p2045_p12 = por %p2044_p1, %p2043_p3 }
 0x1bf   : > { %p2041_p6 = pneg %p2040_p4 }
 0x1c0   : > { %p2047_p5 = por %p2046_p11, %p2045_p12 }
 0x1c2   : > { %p2048_p7 = pnand %p2047_p5, %p2041_p6 }
 0x1c4   : > { %2051 = shalt.err (!%p2048_p7)
}
 0x1c5   : > { %1792 = dma.vmem_to_hbm [thread:$0]  (%p2602_p0), %s2528_s13, 128, %s2526_s20, %s1352_s10  }
 0x1c6 PF: > { %s1378_s9 = sand.u32 1, %s2094_s21   ;;  %p2603_p10 = scmp.ne.s32.totalorder %s2598_s19, 0 }
 0x1c7   : > { %p2604_p13 = scmp.ge.s32.totalorder %s2114_s26, 2  ;;  %s1379_s30 = scalar_lea.sflag [#allocation4], %s1378_s9 }
 0x1c9   : > { %p1812_p2 = pnand %p2604_p13, %p2603_p10 }
 0x1cb   : > { %2089 = dma.done.wait (!%p1812_p2), %s1379_s30, 128  }
 0x1cc   : > { %2091 = vsyncadd (!%p1812_p2), %s1379_s30, 4294967168  ;;  %s24_s26 = sadd.s32 1, %s2114_s26   ;;  %s2605_s21 = smov %s2098_s22 }
 0x1cd   : > { %p21_p8 = scmp.ge.s32.totalorder %s24_s26, 4   ;;  %s2606_s22 = smov %s2102_s23 }
 0x1ce   : > { %s2607_s23 = smov %s2337_s17  ;;  %s2608_s24 = smov %s2110_s25 }
 0x1cf   : > { %s2609_s25 = smov %s2611_s18  ;;  %23 = sbr.rel (!%p21_p8) target bundleno = 10 (0xa), region = 107 }
 0x1d6   :  { %1384 = vsyncpa [#allocation3], 1 }
 0x1d7   :  { %1386 = vsyncpa [#allocation3 + $0x1], 1 }
 0x1d8   :  { %1387 = vsyncpa [#allocation6], 1 }
 0x1d9   :  { %1388 = vsyncpa [#allocation9], 1 }
 0x1da   :  { %1389 = vsyncpa [#allocation4], 1 }
 0x1db   :  { %1391 = vsyncpa [#allocation4 + $0x1], 1 }

</bundles_post_ra>
